<compile_context>
chip_gen: v5e
topology: v5e:2x2
jax: 0.10.0
libtpu: 0.0.40
codegen_flags: <defaults>
</compile_context>

<pallas_src>
import numpy as np
import jax
import jax.numpy as jnp
from jax.experimental import pallas as pl
from jax.experimental.pallas import tpu as pltpu


# ----------------------------------------------------------------------------
# Deterministic parameter construction (matches cv2.getGaussianKernel, sigma > 0)
# ----------------------------------------------------------------------------
def _gaussian_kernel_1d(ksize, sigma):
    if sigma <= 0:
        sigma = 0.3 * ((ksize - 1) * 0.5 - 1) + 0.8
    x = np.arange(ksize, dtype=np.float64) - (ksize - 1) / 2.0
    k = np.exp(-(x * x) / (2.0 * sigma * sigma))
    return k / k.sum()


def _band_matrix(n, k1d):
    """(n, n) banded matrix so that (A @ x) == 1-D cross-correlation of x with k1d
    under replicate ('edge') padding: edge taps are clamped/merged into the border
    rows.  blur2d = A_v @ x @ A_h^T reproduces conv2d(pad_replicate(x), k1 k1^T)."""
    K = len(k1d)
    pad = K // 2
    A = np.zeros((n, n), dtype=np.float64)
    rows = np.arange(n)
    for t in range(K):  # vectorised over n; K is small
        cols = np.clip(rows + t - pad, 0, n - 1)
        np.add.at(A, (rows, cols), k1d[t])
    return A


def _vmem_limit_bytes():
    """Generation-aware VMEM budget with headroom for Mosaic internal scratch."""
    cap = None
    try:
        cap = getattr(pltpu.get_tpu_info(), "vmem_capacity_bytes", None)
    except Exception:
        cap = None
    if not cap:
        cap = 64 * 1024 * 1024
    return int(min(cap * 3 // 4, 100 * 1024 * 1024))


# ----------------------------------------------------------------------------
# Fully fused pyramid kernel:
#   grid = (N, levels-1); per (n, level):
#     blur all planes (2 bf16 MXU matmuls / plane), accumulate
#     out += lap0 + gpm * (lap1 - lap0)   (+ final pure-Gaussian term on last level)
#   Gaussian planes stay resident in VMEM scratch, `out` is a resident accumulator.
# ----------------------------------------------------------------------------
def _fused_blend(x, av_all, aht_all, C):
    """x: (N, 2C+1, H, W) f32 planes of [img0 | img1 | mask].
    av_all: (L-1, H, H) bf16 vertical band matrices (replicate padding folded in).
    aht_all: (L-1, W, W) bf16 horizontal band matrices, already transposed."""
    N, Cm, H, W = x.shape
    L1 = av_all.shape[0]  # levels - 1
    f32 = jnp.float32
    bf16 = jnp.bfloat16

    def kern(x_ref, av_ref, aht_ref, out_ref, xcur_ref):
        lvl = pl.program_id(1)
        nl = pl.num_programs(1)
        is_last = lvl == nl - 1

        @pl.when(lvl == 0)
        def _():
            # Load this sample's planes into the resident scratch; zero the accumulator.
            xcur_ref[...] = x_ref[0]
            out_ref[...] = jnp.zeros_like(out_ref)

        av = av_ref[0]    # (H, H) bf16
        aht = aht_ref[0]  # (W, W) bf16

        def blur(p):
            # Separable Gaussian blur: two native-bf16 MXU matmuls, f32 accumulate.
            tv = jnp.dot(av, p.astype(bf16), preferred_element_type=f32)
            return jnp.dot(tv.astype(bf16), aht, preferred_element_type=f32)

        # Current-level mask Gaussian: read BEFORE it is overwritten with its blur.
        m_cur = xcur_ref[2 * C]
        bm = blur(m_cur)

        # Per image channel: blur, Laplacian, blend-accumulate — minimal live set.
        for c in range(C):
            x0 = xcur_ref[c]
            x1 = xcur_ref[C + c]
            b0 = blur(x0)
            b1 = blur(x1)
            lap0 = x0 - b0
            lap1 = x1 - b1
            delta = lap0 + m_cur * (lap1 - lap0)
            # Last blur level folds in the final (coarsest, pure-Gaussian) level.
            final = b0 + bm * (b1 - b0)
            delta = jnp.where(is_last, delta + final, delta)
            out_ref[0, c] = out_ref[0, c] + delta
            # Next level's Gaussian planes stay resident in VMEM (no HBM round trip).
            xcur_ref[c] = b0
            xcur_ref[C + c] = b1
        xcur_ref[2 * C] = bm

    return pl.pallas_call(
        kern,
        out_shape=jax.ShapeDtypeStruct((N, C, H, W), f32),
        grid_spec=pltpu.PrefetchScalarGridSpec(
            num_scalar_prefetch=0,
            grid=(N, L1),
            in_specs=[
                # Same block index over the level axis -> fetched once per sample.
                pl.BlockSpec((1, Cm, H, W), lambda n, l: (n, 0, 0, 0)),
                pl.BlockSpec((1, H, H), lambda n, l: (l, 0, 0)),
                pl.BlockSpec((1, W, W), lambda n, l: (l, 0, 0)),
            ],
            # Constant over the level axis -> VMEM-resident accumulator.
            out_specs=pl.BlockSpec((1, C, H, W), lambda n, l: (n, 0, 0, 0)),
            scratch_shapes=[pltpu.VMEM((Cm, H, W), f32)],
        ),
        compiler_params=pltpu.CompilerParams(
            dimension_semantics=("parallel", "arbitrary"),
            vmem_limit_bytes=_vmem_limit_bytes()),
    )(x, av_all, aht_all)


# Degenerate case: a single-level pyramid is a plain lerp.
def _blend_only(img0, img1, mask):
    N, C, H, W = img0.shape

    def kern(x0_ref, x1_ref, m_ref, o_ref):
        m = m_ref[0, 0]
        for c in range(C):
            a = x0_ref[0, c]
            o_ref[0, c] = a + m * (x1_ref[0, c] - a)

    return pl.pallas_call(
        kern,
        out_shape=jax.ShapeDtypeStruct((N, C, H, W), jnp.float32),
        grid_spec=pltpu.PrefetchScalarGridSpec(
            num_scalar_prefetch=0,
            grid=(N,),
            in_specs=[pl.BlockSpec((1, C, H, W), lambda n: (n, 0, 0, 0)),
                      pl.BlockSpec((1, C, H, W), lambda n: (n, 0, 0, 0)),
                      pl.BlockSpec((1, 1, H, W), lambda n: (n, 0, 0, 0))],
            out_specs=pl.BlockSpec((1, C, H, W), lambda n: (n, 0, 0, 0))),
        compiler_params=pltpu.CompilerParams(dimension_semantics=("parallel",)),
    )(img0.astype(jnp.float32), img1.astype(jnp.float32), mask.astype(jnp.float32))


# ----------------------------------------------------------------------------
# Module port
# ----------------------------------------------------------------------------
class LaplacianBlenderPallas:
    def __init__(self, levels=5, gaussian_kernel_size=45, gaussian_sigma=1,
                 level_size_adder=0, level_sigma_multiplier=2):
        assert gaussian_kernel_size % 2 == 1
        assert level_size_adder % 2 == 0
        self.levels = levels
        self.k1ds = []  # deterministic buffers (1-D Gaussians), mirrors kernel_{level}
        for level in range(levels):
            width = gaussian_kernel_size + level_size_adder
            sigma = gaussian_sigma * level_sigma_multiplier ** level
            self.k1ds.append(_gaussian_kernel_1d(width, sigma))
        self._band_cache = {}  # (H, W) -> (av_all bf16, aht_all bf16)

    def _bands(self, H, W):
        key = (H, W)
        if key not in self._band_cache:
            avs = np.stack([_band_matrix(H, self.k1ds[l])
                            for l in range(self.levels - 1)])
            ahts = np.stack([_band_matrix(W, self.k1ds[l]).T
                             for l in range(self.levels - 1)])
            self._band_cache[key] = (jnp.asarray(avs, dtype=jnp.bfloat16),
                                     jnp.asarray(ahts, dtype=jnp.bfloat16))
        return self._band_cache[key]

    def forward(self, img0, img1, mask):
        assert img0.ndim == img1.ndim == mask.ndim == 4
        assert mask.shape[1] == 1
        assert img0.shape == img1.shape
        assert mask.shape[2:] == img0.shape[2:]
        N, C, H, W = img0.shape

        if self.levels == 1:
            return _blend_only(img0, img1, mask)

        # Current Gaussian planes of img0 | img1 | mask, stacked along channels.
        x = jnp.concatenate([img0.astype(jnp.float32),
                             img1.astype(jnp.float32),
                             mask.astype(jnp.float32)], axis=1)  # (N, 2C+1, H, W)
        av_all, aht_all = self._bands(H, W)
        return _fused_blend(x, av_all, aht_all, C)

    __call__ = forward


# ----------------------------------------------------------------------------
# Pure-JAX reference (original tap-based semantics) for a sanity check
# ----------------------------------------------------------------------------
def _ref_forward(blender, img0, img1, mask):
    def blur(x, k1d):
        K = len(k1d)
        pad = K // 2
        N, C, H, W = x.shape
        w2d = np.outer(k1d, k1d).astype(np.float32)
        xp = jnp.pad(x, ((0, 0), (0, 0), (pad, pad), (pad, pad)), mode="edge")
        acc = jnp.zeros_like(x)
        for di in range(K):
            for dj in range(K):
                acc = acc + float(w2d[di, dj]) * xp[:, :, di:di + H, dj:dj + W]
        return acc

    def stacks(img):
        lap, gauss = [], []
        cur = img
        for level in range(blender.levels):
            gauss.append(cur)
            if level < blender.levels - 1:
                b = blur(cur, blender.k1ds[level])
                lap.append(cur - b)
                cur = b
            else:
                lap.append(cur)
        return jnp.stack(lap), jnp.stack(gauss)

    lp0, _ = stacks(img0)
    lp1, _ = stacks(img1)
    _, gpm = stacks(mask)
    return (lp0 + gpm * (lp1 - lp0)).sum(axis=0)


if __name__ == "__main__":
    key = jax.random.PRNGKey(0)
    k0, k1, k2 = jax.random.split(key, 3)
    # Small shapes: N=2, C=3 (module's Gaussian buffers target <=3 channels), 16x16 spatial.
    N, C, H, W = 2, 3, 16, 16
    img0 = jax.random.uniform(k0, (N, C, H, W), jnp.float32, -1.0, 1.0)
    img1 = jax.random.uniform(k1, (N, C, H, W), jnp.float32, -1.0, 1.0)
    mask = jax.random.uniform(k2, (N, 1, H, W), jnp.float32, 0.0, 1.0)

    # Pyramid config consistent with 16x16 inputs (pad < H as the original requires).
    blender = LaplacianBlenderPallas(levels=3, gaussian_kernel_size=5,
                                     gaussian_sigma=1, level_size_adder=0,
                                     level_sigma_multiplier=2)

    fwd = jax.jit(blender.forward)
    out = jax.block_until_ready(fwd(img0, img1, mask))

    # bf16 MXU inputs (f32 accumulation) vs. the f32 tap-based reference:
    # expected deviation is O(1e-3); tolerance set accordingly.
    ref = jax.block_until_ready(_ref_forward(blender, img0, img1, mask))
    np.testing.assert_allclose(np.asarray(out), np.asarray(ref), rtol=2e-2, atol=2e-2)

    print("KERNEL_OK")
</pallas_src>

<mosaic_0001>
module attributes {stable_mosaic.version = 11 : i64} {
  func.func @kern(%arg0: i32, %arg1: i32, %arg2: memref<1x7x16x16xf32, #tpu.memory_space<vmem>>, %arg3: memref<1x16x16xbf16, #tpu.memory_space<vmem>>, %arg4: memref<1x16x16xbf16, #tpu.memory_space<vmem>>, %arg5: memref<1x3x16x16xf32, #tpu.memory_space<vmem>>, %arg6: memref<7x16x16xf32, #tpu.memory_space<vmem>>) attributes {dimension_semantics = [#tpu.dimension_semantics<parallel>, #tpu.dimension_semantics<arbitrary>], iteration_bounds = array<i64: 2, 2>, scalar_prefetch = 0 : i64, scratch_operands = 1 : i64, tpu.core_type = #tpu.core_type<tc>, window_params = [{transform_indices = @transform_0, window_bounds = array<i64: 1, 7, 16, 16>}, {transform_indices = @transform_1, window_bounds = array<i64: 1, 16, 16>}, {transform_indices = @transform_2, window_bounds = array<i64: 1, 16, 16>}, {transform_indices = @transform_3, window_bounds = array<i64: 1, 3, 16, 16>}]} {
    %c1_i32 = arith.constant 1 : i32
    %0 = arith.cmpi eq, %arg1, %c1_i32 : i32
    %c0_i32 = arith.constant 0 : i32
    %1 = arith.cmpi eq, %arg1, %c0_i32 : i32
    %2 = arith.extui %1 : i1 to i32
    %c0_i32_0 = arith.constant 0 : i32
    %3 = arith.cmpi ne, %2, %c0_i32_0 : i32
    scf.if %3 {
      %c0_79 = arith.constant 0 : index
      %c0_80 = arith.constant 0 : index
      %c0_81 = arith.constant 0 : index
      %c0_82 = arith.constant 0 : index
      %119 = vector.load %arg2[%c0_79, %c0_80, %c0_81, %c0_82] : memref<1x7x16x16xf32, #tpu.memory_space<vmem>>, vector<1x7x16x16xf32>
      %120 = vector.shape_cast %119 : vector<1x7x16x16xf32> to vector<7x16x16xf32>
      %c0_83 = arith.constant 0 : index
      %c0_84 = arith.constant 0 : index
      %c0_85 = arith.constant 0 : index
      %121 = vector.load %arg6[%c0_83, %c0_84, %c0_85] : memref<7x16x16xf32, #tpu.memory_space<vmem>>, vector<7x16x16xf32>
      tpu.vector_store %arg6[%c0_83, %c0_84, %c0_85], %120 {strides = array<i32>} : memref<7x16x16xf32, #tpu.memory_space<vmem>>, vector<7x16x16xf32>,
      %cst_86 = arith.constant 0.000000e+00 : f32
      %122 = vector.broadcast %cst_86 : f32 to vector<1x3x16x16xf32>
      %c0_87 = arith.constant 0 : index
      %c0_88 = arith.constant 0 : index
      %c0_89 = arith.constant 0 : index
      %c0_90 = arith.constant 0 : index
      %123 = vector.load %arg5[%c0_87, %c0_88, %c0_89, %c0_90] : memref<1x3x16x16xf32, #tpu.memory_space<vmem>>, vector<1x3x16x16xf32>
      tpu.vector_store %arg5[%c0_87, %c0_88, %c0_89, %c0_90], %122 {strides = array<i32>} : memref<1x3x16x16xf32, #tpu.memory_space<vmem>>, vector<1x3x16x16xf32>,
    } else {
    }
    %c0 = arith.constant 0 : index
    %c0_1 = arith.constant 0 : index
    %c0_2 = arith.constant 0 : index
    %4 = vector.load %arg3[%c0, %c0_1, %c0_2] : memref<1x16x16xbf16, #tpu.memory_space<vmem>>, vector<1x16x16xbf16>
    %5 = vector.shape_cast %4 : vector<1x16x16xbf16> to vector<16x16xbf16>
    %c0_3 = arith.constant 0 : index
    %c0_4 = arith.constant 0 : index
    %c0_5 = arith.constant 0 : index
    %6 = vector.load %arg4[%c0_3, %c0_4, %c0_5] : memref<1x16x16xbf16, #tpu.memory_space<vmem>>, vector<1x16x16xbf16>
    %7 = vector.shape_cast %6 : vector<1x16x16xbf16> to vector<16x16xbf16>
    %c6 = arith.constant 6 : index
    %c0_6 = arith.constant 0 : index
    %c0_7 = arith.constant 0 : index
    %8 = vector.load %arg6[%c6, %c0_6, %c0_7] : memref<7x16x16xf32, #tpu.memory_space<vmem>>, vector<1x16x16xf32>
    %9 = vector.shape_cast %8 : vector<1x16x16xf32> to vector<16x16xf32>
    %10 = arith.truncf %9 : vector<16x16xf32> to vector<16x16xbf16>
    %cst = arith.constant dense<0.000000e+00> : vector<16x16xf32>
    %11 = tpu.matmul %5, %10, %cst {dimension_numbers = #tpu.dot_dimension_numbers<[1], [0], [0], [1], [0, 0, 1, 1], [], []>} : vector<16x16xbf16>, vector<16x16xbf16>, vector<16x16xf32> -> vector<16x16xf32>
    %12 = arith.truncf %11 : vector<16x16xf32> to vector<16x16xbf16>
    %cst_8 = arith.constant dense<0.000000e+00> : vector<16x16xf32>
    %13 = tpu.matmul %12, %7, %cst_8 {dimension_numbers = #tpu.dot_dimension_numbers<[1], [0], [0], [1], [0, 0, 1, 1], [], []>} : vector<16x16xbf16>, vector<16x16xbf16>, vector<16x16xf32> -> vector<16x16xf32>
    %c0_9 = arith.constant 0 : index
    %c0_10 = arith.constant 0 : index
    %c0_11 = arith.constant 0 : index
    %14 = vector.load %arg6[%c0_9, %c0_10, %c0_11] : memref<7x16x16xf32, #tpu.memory_space<vmem>>, vector<1x16x16xf32>
    %15 = vector.shape_cast %14 : vector<1x16x16xf32> to vector<16x16xf32>
    %c3 = arith.constant 3 : index
    %c0_12 = arith.constant 0 : index
    %c0_13 = arith.constant 0 : index
    %16 = vector.load %arg6[%c3, %c0_12, %c0_13] : memref<7x16x16xf32, #tpu.memory_space<vmem>>, vector<1x16x16xf32>
    %17 = vector.shape_cast %16 : vector<1x16x16xf32> to vector<16x16xf32>
    %18 = arith.truncf %15 : vector<16x16xf32> to vector<16x16xbf16>
    %cst_14 = arith.constant dense<0.000000e+00> : vector<16x16xf32>
    %19 = tpu.matmul %5, %18, %cst_14 {dimension_numbers = #tpu.dot_dimension_numbers<[1], [0], [0], [1], [0, 0, 1, 1], [], []>} : vector<16x16xbf16>, vector<16x16xbf16>, vector<16x16xf32> -> vector<16x16xf32>
    %20 = arith.truncf %19 : vector<16x16xf32> to vector<16x16xbf16>
    %cst_15 = arith.constant dense<0.000000e+00> : vector<16x16xf32>
    %21 = tpu.matmul %20, %7, %cst_15 {dimension_numbers = #tpu.dot_dimension_numbers<[1], [0], [0], [1], [0, 0, 1, 1], [], []>} : vector<16x16xbf16>, vector<16x16xbf16>, vector<16x16xf32> -> vector<16x16xf32>
    %22 = arith.truncf %17 : vector<16x16xf32> to vector<16x16xbf16>
    %cst_16 = arith.constant dense<0.000000e+00> : vector<16x16xf32>
    %23 = tpu.matmul %5, %22, %cst_16 {dimension_numbers = #tpu.dot_dimension_numbers<[1], [0], [0], [1], [0, 0, 1, 1], [], []>} : vector<16x16xbf16>, vector<16x16xbf16>, vector<16x16xf32> -> vector<16x16xf32>
    %24 = arith.truncf %23 : vector<16x16xf32> to vector<16x16xbf16>
    %cst_17 = arith.constant dense<0.000000e+00> : vector<16x16xf32>
    %25 = tpu.matmul %24, %7, %cst_17 {dimension_numbers = #tpu.dot_dimension_numbers<[1], [0], [0], [1], [0, 0, 1, 1], [], []>} : vector<16x16xbf16>, vector<16x16xbf16>, vector<16x16xf32> -> vector<16x16xf32>
    %26 = arith.subf %15, %21 : vector<16x16xf32>
    %27 = arith.subf %17, %25 : vector<16x16xf32>
    %28 = arith.subf %27, %26 : vector<16x16xf32>
    %29 = arith.mulf %9, %28 : vector<16x16xf32>
    %30 = arith.addf %26, %29 : vector<16x16xf32>
    %31 = arith.subf %25, %21 : vector<16x16xf32>
    %32 = arith.mulf %13, %31 : vector<16x16xf32>
    %33 = arith.addf %21, %32 : vector<16x16xf32>
    %34 = arith.addf %30, %33 : vector<16x16xf32>
    %35 = arith.select %0, %34, %30 : vector<16x16xf32>
    %c0_18 = arith.constant 0 : index
    %c0_19 = arith.constant 0 : index
    %c0_20 = arith.constant 0 : index
    %c0_21 = arith.constant 0 : index
    %36 = vector.load %arg5[%c0_18, %c0_19, %c0_20, %c0_21] : memref<1x3x16x16xf32, #tpu.memory_space<vmem>>, vector<1x1x16x16xf32>
    %37 = vector.shape_cast %36 : vector<1x1x16x16xf32> to vector<16x16xf32>
    %38 = arith.addf %37, %35 : vector<16x16xf32>
    %c0_22 = arith.constant 0 : index
    %c0_23 = arith.constant 0 : index
    %c0_24 = arith.constant 0 : index
    %c0_25 = arith.constant 0 : index
    %39 = vector.load %arg5[%c0_22, %c0_23, %c0_24, %c0_25] : memref<1x3x16x16xf32, #tpu.memory_space<vmem>>, vector<1x1x16x16xf32>
    %40 = vector.shape_cast %39 : vector<1x1x16x16xf32> to vector<16x16xf32>
    %41 = vector.shape_cast %38 : vector<16x16xf32> to vector<1x1x16x16xf32>
    tpu.vector_store %arg5[%c0_22, %c0_23, %c0_24, %c0_25], %41 {strides = array<i32>} : memref<1x3x16x16xf32, #tpu.memory_space<vmem>>, vector<1x1x16x16xf32>,
    %c0_26 = arith.constant 0 : index
    %c0_27 = arith.constant 0 : index
    %c0_28 = arith.constant 0 : index
    %42 = vector.load %arg6[%c0_26, %c0_27, %c0_28] : memref<7x16x16xf32, #tpu.memory_space<vmem>>, vector<1x16x16xf32>
    %43 = vector.shape_cast %42 : vector<1x16x16xf32> to vector<16x16xf32>
    %44 = vector.shape_cast %21 : vector<16x16xf32> to vector<1x16x16xf32>
    tpu.vector_store %arg6[%c0_26, %c0_27, %c0_28], %44 {strides = array<i32>} : memref<7x16x16xf32, #tpu.memory_space<vmem>>, vector<1x16x16xf32>,
    %c3_29 = arith.constant 3 : index
    %c0_30 = arith.constant 0 : index
    %c0_31 = arith.constant 0 : index
    %45 = vector.load %arg6[%c3_29, %c0_30, %c0_31] : memref<7x16x16xf32, #tpu.memory_space<vmem>>, vector<1x16x16xf32>
    %46 = vector.shape_cast %45 : vector<1x16x16xf32> to vector<16x16xf32>
    %47 = vector.shape_cast %25 : vector<16x16xf32> to vector<1x16x16xf32>
    tpu.vector_store %arg6[%c3_29, %c0_30, %c0_31], %47 {strides = array<i32>} : memref<7x16x16xf32, #tpu.memory_space<vmem>>, vector<1x16x16xf32>,
    %c1 = arith.constant 1 : index
    %c0_32 = arith.constant 0 : index
    %c0_33 = arith.constant 0 : index
    %48 = vector.load %arg6[%c1, %c0_32, %c0_33] : memref<7x16x16xf32, #tpu.memory_space<vmem>>, vector<1x16x16xf32>
    %49 = vector.shape_cast %48 : vector<1x16x16xf32> to vector<16x16xf32>
    %c4 = arith.constant 4 : index
    %c0_34 = arith.constant 0 : index
    %c0_35 = arith.constant 0 : index
    %50 = vector.load %arg6[%c4, %c0_34, %c0_35] : memref<7x16x16xf32, #tpu.memory_space<vmem>>, vector<1x16x16xf32>
    %51 = vector.shape_cast %50 : vector<1x16x16xf32> to vector<16x16xf32>
    %52 = arith.truncf %49 : vector<16x16xf32> to vector<16x16xbf16>
    %cst_36 = arith.constant dense<0.000000e+00> : vector<16x16xf32>
    %53 = tpu.matmul %5, %52, %cst_36 {dimension_numbers = #tpu.dot_dimension_numbers<[1], [0], [0], [1], [0, 0, 1, 1], [], []>} : vector<16x16xbf16>, vector<16x16xbf16>, vector<16x16xf32> -> vector<16x16xf32>
    %54 = arith.truncf %53 : vector<16x16xf32> to vector<16x16xbf16>
    %cst_37 = arith.constant dense<0.000000e+00> : vector<16x16xf32>
    %55 = tpu.matmul %54, %7, %cst_37 {dimension_numbers = #tpu.dot_dimension_numbers<[1], [0], [0], [1], [0, 0, 1, 1], [], []>} : vector<16x16xbf16>, vector<16x16xbf16>, vector<16x16xf32> -> vector<16x16xf32>
    %56 = arith.truncf %51 : vector<16x16xf32> to vector<16x16xbf16>
    %cst_38 = arith.constant dense<0.000000e+00> : vector<16x16xf32>
    %57 = tpu.matmul %5, %56, %cst_38 {dimension_numbers = #tpu.dot_dimension_numbers<[1], [0], [0], [1], [0, 0, 1, 1], [], []>} : vector<16x16xbf16>, vector<16x16xbf16>, vector<16x16xf32> -> vector<16x16xf32>
    %58 = arith.truncf %57 : vector<16x16xf32> to vector<16x16xbf16>
    %cst_39 = arith.constant dense<0.000000e+00> : vector<16x16xf32>
    %59 = tpu.matmul %58, %7, %cst_39 {dimension_numbers = #tpu.dot_dimension_numbers<[1], [0], [0], [1], [0, 0, 1, 1], [], []>} : vector<16x16xbf16>, vector<16x16xbf16>, vector<16x16xf32> -> vector<16x16xf32>
    %60 = arith.subf %49, %55 : vector<16x16xf32>
    %61 = arith.subf %51, %59 : vector<16x16xf32>
    %62 = arith.subf %61, %60 : vector<16x16xf32>
    %63 = arith.mulf %9, %62 : vector<16x16xf32>
    %64 = arith.addf %60, %63 : vector<16x16xf32>
    %65 = arith.subf %59, %55 : vector<16x16xf32>
    %66 = arith.mulf %13, %65 : vector<16x16xf32>
    %67 = arith.addf %55, %66 : vector<16x16xf32>
    %68 = arith.addf %64, %67 : vector<16x16xf32>
    %69 = arith.select %0, %68, %64 : vector<16x16xf32>
    %c0_40 = arith.constant 0 : index
    %c1_41 = arith.constant 1 : index
    %c0_42 = arith.constant 0 : index
    %c0_43 = arith.constant 0 : index
    %70 = vector.load %arg5[%c0_40, %c1_41, %c0_42, %c0_43] : memref<1x3x16x16xf32, #tpu.memory_space<vmem>>, vector<1x1x16x16xf32>
    %71 = vector.shape_cast %70 : vector<1x1x16x16xf32> to vector<16x16xf32>
    %72 = arith.addf %71, %69 : vector<16x16xf32>
    %c0_44 = arith.constant 0 : index
    %c1_45 = arith.constant 1 : index
    %c0_46 = arith.constant 0 : index
    %c0_47 = arith.constant 0 : index
    %73 = vector.load %arg5[%c0_44, %c1_45, %c0_46, %c0_47] : memref<1x3x16x16xf32, #tpu.memory_space<vmem>>, vector<1x1x16x16xf32>
    %74 = vector.shape_cast %73 : vector<1x1x16x16xf32> to vector<16x16xf32>
    %75 = vector.shape_cast %72 : vector<16x16xf32> to vector<1x1x16x16xf32>
    tpu.vector_store %arg5[%c0_44, %c1_45, %c0_46, %c0_47], %75 {strides = array<i32>} : memref<1x3x16x16xf32, #tpu.memory_space<vmem>>, vector<1x1x16x16xf32>,
    %c1_48 = arith.constant 1 : index
    %c0_49 = arith.constant 0 : index
    %c0_50 = arith.constant 0 : index
    %76 = vector.load %arg6[%c1_48, %c0_49, %c0_50] : memref<7x16x16xf32, #tpu.memory_space<vmem>>, vector<1x16x16xf32>
    %77 = vector.shape_cast %76 : vector<1x16x16xf32> to vector<16x16xf32>
    %78 = vector.shape_cast %55 : vector<16x16xf32> to vector<1x16x16xf32>
    tpu.vector_store %arg6[%c1_48, %c0_49, %c0_50], %78 {strides = array<i32>} : memref<7x16x16xf32, #tpu.memory_space<vmem>>, vector<1x16x16xf32>,
    %c4_51 = arith.constant 4 : index
    %c0_52 = arith.constant 0 : index
    %c0_53 = arith.constant 0 : index
    %79 = vector.load %arg6[%c4_51, %c0_52, %c0_53] : memref<7x16x16xf32, #tpu.memory_space<vmem>>, vector<1x16x16xf32>
    %80 = vector.shape_cast %79 : vector<1x16x16xf32> to vector<16x16xf32>
    %81 = vector.shape_cast %59 : vector<16x16xf32> to vector<1x16x16xf32>
    tpu.vector_store %arg6[%c4_51, %c0_52, %c0_53], %81 {strides = array<i32>} : memref<7x16x16xf32, #tpu.memory_space<vmem>>, vector<1x16x16xf32>,
    %c2 = arith.constant 2 : index
    %c0_54 = arith.constant 0 : index
    %c0_55 = arith.constant 0 : index
    %82 = vector.load %arg6[%c2, %c0_54, %c0_55] : memref<7x16x16xf32, #tpu.memory_space<vmem>>, vector<1x16x16xf32>
    %83 = vector.shape_cast %82 : vector<1x16x16xf32> to vector<16x16xf32>
    %c5 = arith.constant 5 : index
    %c0_56 = arith.constant 0 : index
    %c0_57 = arith.constant 0 : index
    %84 = vector.load %arg6[%c5, %c0_56, %c0_57] : memref<7x16x16xf32, #tpu.memory_space<vmem>>, vector<1x16x16xf32>
    %85 = vector.shape_cast %84 : vector<1x16x16xf32> to vector<16x16xf32>
    %86 = arith.truncf %83 : vector<16x16xf32> to vector<16x16xbf16>
    %cst_58 = arith.constant dense<0.000000e+00> : vector<16x16xf32>
    %87 = tpu.matmul %5, %86, %cst_58 {dimension_numbers = #tpu.dot_dimension_numbers<[1], [0], [0], [1], [0, 0, 1, 1], [], []>} : vector<16x16xbf16>, vector<16x16xbf16>, vector<16x16xf32> -> vector<16x16xf32>
    %88 = arith.truncf %87 : vector<16x16xf32> to vector<16x16xbf16>
    %cst_59 = arith.constant dense<0.000000e+00> : vector<16x16xf32>
    %89 = tpu.matmul %88, %7, %cst_59 {dimension_numbers = #tpu.dot_dimension_numbers<[1], [0], [0], [1], [0, 0, 1, 1], [], []>} : vector<16x16xbf16>, vector<16x16xbf16>, vector<16x16xf32> -> vector<16x16xf32>
    %90 = arith.truncf %85 : vector<16x16xf32> to vector<16x16xbf16>
    %cst_60 = arith.constant dense<0.000000e+00> : vector<16x16xf32>
    %91 = tpu.matmul %5, %90, %cst_60 {dimension_numbers = #tpu.dot_dimension_numbers<[1], [0], [0], [1], [0, 0, 1, 1], [], []>} : vector<16x16xbf16>, vector<16x16xbf16>, vector<16x16xf32> -> vector<16x16xf32>
    %92 = arith.truncf %91 : vector<16x16xf32> to vector<16x16xbf16>
    %cst_61 = arith.constant dense<0.000000e+00> : vector<16x16xf32>
    %93 = tpu.matmul %92, %7, %cst_61 {dimension_numbers = #tpu.dot_dimension_numbers<[1], [0], [0], [1], [0, 0, 1, 1], [], []>} : vector<16x16xbf16>, vector<16x16xbf16>, vector<16x16xf32> -> vector<16x16xf32>
    %94 = arith.subf %83, %89 : vector<16x16xf32>
    %95 = arith.subf %85, %93 : vector<16x16xf32>
    %96 = arith.subf %95, %94 : vector<16x16xf32>
    %97 = arith.mulf %9, %96 : vector<16x16xf32>
    %98 = arith.addf %94, %97 : vector<16x16xf32>
    %99 = arith.subf %93, %89 : vector<16x16xf32>
    %100 = arith.mulf %13, %99 : vector<16x16xf32>
    %101 = arith.addf %89, %100 : vector<16x16xf32>
    %102 = arith.addf %98, %101 : vector<16x16xf32>
    %103 = arith.select %0, %102, %98 : vector<16x16xf32>
    %c0_62 = arith.constant 0 : index
    %c2_63 = arith.constant 2 : index
    %c0_64 = arith.constant 0 : index
    %c0_65 = arith.constant 0 : index
    %104 = vector.load %arg5[%c0_62, %c2_63, %c0_64, %c0_65] : memref<1x3x16x16xf32, #tpu.memory_space<vmem>>, vector<1x1x16x16xf32>
    %105 = vector.shape_cast %104 : vector<1x1x16x16xf32> to vector<16x16xf32>
    %106 = arith.addf %105, %103 : vector<16x16xf32>
    %c0_66 = arith.constant 0 : index
    %c2_67 = arith.constant 2 : index
    %c0_68 = arith.constant 0 : index
    %c0_69 = arith.constant 0 : index
    %107 = vector.load %arg5[%c0_66, %c2_67, %c0_68, %c0_69] : memref<1x3x16x16xf32, #tpu.memory_space<vmem>>, vector<1x1x16x16xf32>
    %108 = vector.shape_cast %107 : vector<1x1x16x16xf32> to vector<16x16xf32>
    %109 = vector.shape_cast %106 : vector<16x16xf32> to vector<1x1x16x16xf32>
    tpu.vector_store %arg5[%c0_66, %c2_67, %c0_68, %c0_69], %109 {strides = array<i32>} : memref<1x3x16x16xf32, #tpu.memory_space<vmem>>, vector<1x1x16x16xf32>,
    %c2_70 = arith.constant 2 : index
    %c0_71 = arith.constant 0 : index
    %c0_72 = arith.constant 0 : index
    %110 = vector.load %arg6[%c2_70, %c0_71, %c0_72] : memref<7x16x16xf32, #tpu.memory_space<vmem>>, vector<1x16x16xf32>
    %111 = vector.shape_cast %110 : vector<1x16x16xf32> to vector<16x16xf32>
    %112 = vector.shape_cast %89 : vector<16x16xf32> to vector<1x16x16xf32>
    tpu.vector_store %arg6[%c2_70, %c0_71, %c0_72], %112 {strides = array<i32>} : memref<7x16x16xf32, #tpu.memory_space<vmem>>, vector<1x16x16xf32>,
    %c5_73 = arith.constant 5 : index
    %c0_74 = arith.constant 0 : index
    %c0_75 = arith.constant 0 : index
    %113 = vector.load %arg6[%c5_73, %c0_74, %c0_75] : memref<7x16x16xf32, #tpu.memory_space<vmem>>, vector<1x16x16xf32>
    %114 = vector.shape_cast %113 : vector<1x16x16xf32> to vector<16x16xf32>
    %115 = vector.shape_cast %93 : vector<16x16xf32> to vector<1x16x16xf32>
    tpu.vector_store %arg6[%c5_73, %c0_74, %c0_75], %115 {strides = array<i32>} : memref<7x16x16xf32, #tpu.memory_space<vmem>>, vector<1x16x16xf32>,
    %c6_76 = arith.constant 6 : index
    %c0_77 = arith.constant 0 : index
    %c0_78 = arith.constant 0 : index
    %116 = vector.load %arg6[%c6_76, %c0_77, %c0_78] : memref<7x16x16xf32, #tpu.memory_space<vmem>>, vector<1x16x16xf32>
    %117 = vector.shape_cast %116 : vector<1x16x16xf32> to vector<16x16xf32>
    %118 = vector.shape_cast %13 : vector<16x16xf32> to vector<1x16x16xf32>
    tpu.vector_store %arg6[%c6_76, %c0_77, %c0_78], %118 {strides = array<i32>} : memref<7x16x16xf32, #tpu.memory_space<vmem>>, vector<1x16x16xf32>,
    return
  }
  func.func @transform_0(%arg0: i32, %arg1: i32) -> (i32, i32, i32, i32) {
    %c0_i32 = arith.constant 0 : i32
    %c0_i32_0 = arith.constant 0 : i32
    %c0_i32_1 = arith.constant 0 : i32
    %c0_i32_2 = arith.constant 0 : i32
    return %arg0, %c0_i32, %c0_i32_0, %c0_i32_1 : i32, i32, i32, i32
  }
  func.func @transform_1(%arg0: i32, %arg1: i32) -> (i32, i32, i32) {
    %c0_i32 = arith.constant 0 : i32
    %c0_i32_0 = arith.constant 0 : i32
    %c0_i32_1 = arith.constant 0 : i32
    return %arg1, %c0_i32, %c0_i32_0 : i32, i32, i32
  }
  func.func @transform_2(%arg0: i32, %arg1: i32) -> (i32, i32, i32) {
    %c0_i32 = arith.constant 0 : i32
    %c0_i32_0 = arith.constant 0 : i32
    %c0_i32_1 = arith.constant 0 : i32
    return %arg1, %c0_i32, %c0_i32_0 : i32, i32, i32
  }
  func.func @transform_3(%arg0: i32, %arg1: i32) -> (i32, i32, i32, i32) {
    %c0_i32 = arith.constant 0 : i32
    %c0_i32_0 = arith.constant 0 : i32
    %c0_i32_1 = arith.constant 0 : i32
    %c0_i32_2 = arith.constant 0 : i32
    return %arg0, %c0_i32, %c0_i32_0, %c0_i32_1 : i32, i32, i32, i32
  }
}

</mosaic_0001>

<bundles_post_ra>
// kernel: forward.1
= control target key start
LH: loop header
LB: loop body
LE: loop exit
PB: predicated region body
PF: predicated region fallthrough
CT: control target
= control target key end

     0   :  { %8 = vsyncpa [#allocation4], 0  ;;  %s1304_s0 = inlined_call_operand.vmem [shape: f32[2,7,16,16], index: 0, kind: input, shape index: {}]   ;;  %s1305_s1 = inlined_call_operand.vmem [shape: bf16[2,16,16], index: 1, kind: input, shape index: {}]   ;;  %s1306_s2 = inlined_call_operand.vmem [shape: bf16[2,16,16], index: 2, kind: input, shape index: {}]   ;;  %s1307_s3 = inlined_call_operand.hbm [shape: f32[2,3,16,16], index: 3, kind: output, shape index: {}]  }
   0x1   :  { %10 = vsyncpa [#allocation4 + $0x1], 0  ;;  %s986_s12 = smov 0   ;;  %s988_s13 = smov 0  }
   0x2   :  { %s990_s14 = smov 0   ;;  %s992_s15 = smov 0  }
   0x3   :  { %s994_s16 = smov 0   ;;  %s996_s17 = smov 0  }
   0x4   :  { %s998_s18 = smov 0   ;;  %s1000_s19 = smov 0  }
   0x5 LB: > { %s742_s20 = sadd.s32 4294967295, %s961_s19   ;;  %s743_s21 = sadd.s32 4294967294, %s961_s19   ;;  %s961_s19 = sphi %s1000_s19, %s16_s19   ;;  %s957_s18 = sphi %s998_s18, %s1323_s18   ;;  %s953_s17 = sphi %s996_s17, %s1322_s17   ;;  %s949_s16 = sphi %s994_s16, %s1321_s16   ;;  %s945_s15 = sphi %s992_s15, %s1320_s15   ;;  %s941_s14 = sphi %s990_s14, %s1319_s14   ;;  %s937_s13 = sphi %s988_s13, %s1318_s13   ;;  %s933_s12 = sphi %s986_s12, %s1317_s12  }
   0x6   : > { %s25_s22 = sadd.s32 1, %s953_s17  ;;  %s28_s23 = sadd.s32 1, %s957_s18 }
   0x7   : > { %p26_p0 = scmp.ge.s32.totalorder %s25_s22, 2  ;;  %p123_p1 = scmp.ne.s32.totalorder %s941_s14, %s937_s13 }
   0x8   : > { %p124_p2 = scmp.eq.s32.totalorder %s742_s20, 3  ;;  %p129_p4 = scmp.ne.s32.totalorder %s937_s13, %s933_s12 }
   0x9   : > { %s1325_s22 = smov (%p26_p0, %s25_s22), 0  ;;  %s1327_s23 = smov (!%p26_p0, %s28_s23), %s957_s18 }
   0xa   : > { %p1035_p3 = por %p124_p2, %p123_p1  ;;  %p30_p5 = scmp.ge.s32.totalorder %s1327_s23, 2 }
   0xb   : > { %p130_p6 = scmp.eq.s32.totalorder %s743_s21, 3  ;;  %p746_p7 = scmp.ge.s32.totalorder %s961_s19, 1 }
   0xc   : > { %p172_p8 = scmp.lt.s32.totalorder %s961_s19, 5  ;;  %s1329_s23 = smov (%p30_p5, %s1327_s23), 0 }
   0xd   : > { %1311 = sst [smem:[#allocation6_spill]] %s1329_s23  ;;  %p1045_p9 = por %p130_p6, %p129_p4 }
   0xe   : > { %p173_p10 = pnand %p746_p7, %p172_p8  ;;  %s110_s26 = ssub.s32 %s957_s18, %s1329_s23 }
   0xf   : > { %s113_s27 = sadd.s32 1, %s941_s14  ;;  %p111_p11 = scmp.eq.s32.totalorder %s110_s26, 0 }
  0x10   : > { %176 = sbr.rel (%p173_p10) target bundleno = 391 (0x187), region = 32  ;;  %s1308_s29 = sand.u32 (!%p173_p10), 1, %s937_s13  }
  0x11   : > { %s1053_s28 = scalar_select %p111_p11, %s941_s14, %s113_s27  }
  0x12   : > { %p206_p12 = scmp.lt.s32.totalorder (!%p173_p10), %s949_s16, 1  ;;  %s790_s30 = smul.u32 (!%p173_p10), 48, %s1308_s29 }
  0x13   : > { %p211_p13 = scmp.lt.s32.totalorder (!%p173_p10), %s945_s15, 1  ;;  %p222_p0 = scmp.eq.s32.totalorder (!%p173_p10), %s945_s15, 1 }
  0x14   : > { %s1078_s23 = scalar_lea.vmem (!%p173_p10), [#allocation3], %s790_s30  ;;  %p752_p1 = scmp.ne.s32.totalorder (!%p173_p10), %s945_s15, 0 }
  0x15   : > { %s207_s4 = scalar_select %p206_p12, %s949_s16, 1 }
  0x16   : > { %s212_s6 = scalar_select %p211_p13, %s945_s15, 1 }
  0x17   : > { %s791_s5 = smul.u32 112, %s207_s4 }
  0x18   : > { %s786_s10 = sshll.u32 %s212_s6, 3  ;;  %226 = sbr.rel (%p752_p1) target bundleno = 50 (0x32), region = 36 }
  0x19   : > { %s1066_s9 = scalar_lea.vmem %s1304_s0, %s791_s5  ;;  %s1071_s21 = scalar_lea.vmem %s1305_s1, %s786_s10 }
  0x1a   : > { %s1076_s29 = scalar_lea.vmem %s1306_s2, %s786_s10 }
  0x1d   : > { %v227_v0 = vld [vmem:[%s1066_s9] sm:$0xff]  ;;  %vm241_vm0 = vcmask 130048   ;;  %v228_v1 = vld [vmem:[%s1066_s9 + $0x8] sm:$0xff]  ;;  %v229_v2 = vld [vmem:[%s1066_s9 + $0x10] sm:$0xff]  ;;  %v963_v14 = vmov 0.0  }
  0x1e   : > { %242 = vst.msk [vmem:[#allocation2] sm:$0xff] %vm241_vm0, %v227_v0  ;;  %v230_v3 = vld [vmem:[%s1066_s9 + $0x18] sm:$0xff]  ;;  %v231_v4 = vld [vmem:[%s1066_s9 + $0x20] sm:$0xff]  ;;  %v232_v5 = vld [vmem:[%s1066_s9 + $0x28] sm:$0xff] }
  0x1f   : > { %243 = vst.msk [vmem:[#allocation2 + $0x8] sm:$0xff] %vm241_vm0, %v228_v1  ;;  %v233_v6 = vld [vmem:[%s1066_s9 + $0x30] sm:$0xff]  ;;  %v234_v7 = vld [vmem:[%s1066_s9 + $0x38] sm:$0xff]  ;;  %v235_v8 = vld [vmem:[%s1066_s9 + $0x40] sm:$0xff] }
  0x20   : > { %244 = vst.msk [vmem:[#allocation2 + $0x10] sm:$0xff] %vm241_vm0, %v229_v2  ;;  %v236_v9 = vld [vmem:[%s1066_s9 + $0x48] sm:$0xff]  ;;  %v237_v10 = vld [vmem:[%s1066_s9 + $0x50] sm:$0xff]  ;;  %v238_v11 = vld [vmem:[%s1066_s9 + $0x58] sm:$0xff] }
  0x21   : > { %245 = vst.msk [vmem:[#allocation2 + $0x18] sm:$0xff] %vm241_vm0, %v230_v3  ;;  %v239_v12 = vld [vmem:[%s1066_s9 + $0x60] sm:$0xff]  ;;  %v240_v13 = vld [vmem:[%s1066_s9 + $0x68] sm:$0xff] }
  0x22   : > { %246 = vst.msk [vmem:[#allocation2 + $0x20] sm:$0xff] %vm241_vm0, %v231_v4 }
  0x23   : > { %247 = vst.msk [vmem:[#allocation2 + $0x28] sm:$0xff] %vm241_vm0, %v232_v5 }
  0x24   : > { %248 = vst.msk [vmem:[#allocation2 + $0x30] sm:$0xff] %vm241_vm0, %v233_v6 }
  0x25   : > { %249 = vst.msk [vmem:[#allocation2 + $0x38] sm:$0xff] %vm241_vm0, %v234_v7 }
  0x26   : > { %250 = vst.msk [vmem:[#allocation2 + $0x40] sm:$0xff] %vm241_vm0, %v235_v8 }
  0x27   : > { %251 = vst.msk [vmem:[#allocation2 + $0x48] sm:$0xff] %vm241_vm0, %v236_v9 }
  0x28   : > { %252 = vst.msk [vmem:[#allocation2 + $0x50] sm:$0xff] %vm241_vm0, %v237_v10 }
  0x29   : > { %253 = vst.msk [vmem:[#allocation2 + $0x58] sm:$0xff] %vm241_vm0, %v238_v11 }
  0x2a   : > { %254 = vst.msk [vmem:[#allocation2 + $0x60] sm:$0xff] %vm241_vm0, %v239_v12 }
  0x2b   : > { %255 = vst.msk [vmem:[#allocation2 + $0x68] sm:$0xff] %vm241_vm0, %v240_v13 }
  0x2c   : > { %256 = vst.msk [vmem:[%s1078_s23] sm:$0xff] %vm241_vm0, %v963_v14 }
  0x2d   : > { %257 = vst.msk [vmem:[%s1078_s23 + $0x8] sm:$0xff] %vm241_vm0, %v963_v14 }
  0x2e   : > { %258 = vst.msk [vmem:[%s1078_s23 + $0x10] sm:$0xff] %vm241_vm0, %v963_v14 }
  0x2f   : > { %259 = vst.msk [vmem:[%s1078_s23 + $0x18] sm:$0xff] %vm241_vm0, %v963_v14 }
  0x30   : > { %260 = vst.msk [vmem:[%s1078_s23 + $0x20] sm:$0xff] %vm241_vm0, %v963_v14 }
  0x31   : > { %261 = vst.msk [vmem:[%s1078_s23 + $0x28] sm:$0xff] %vm241_vm0, %v963_v14 }
  0x32 PF: > { %v1121_v15 = vld [vmem:[#allocation2 + $0x60] sm:$0xff]  ;;  %v1123_v16 = vld [vmem:[#allocation2 + $0x68] sm:$0xff]  ;;  %v1132_v21 = vld [vmem:[#allocation2 + $0x30] sm:$0xff]  ;;  %vm275_vm1 = vcmask 130048   ;;  %s792_s15 = smul.u32 48, %s949_s16  ;;  %s642_s16 = sshll.u32 %s1078_s23, 4  ;;  %s643_s16 = int_to_ptr.vmem [resolvable:$true] %s642_s16 }
  0x33   : > { %v1125_v17 = vld [vmem:[#allocation2] sm:$0xff]  ;;  %v269_v18 = vpack.c.bf16 %v1123_v16, %v1121_v15  ;;  %v1129_v19 = vld [vmem:[#allocation2 + $0x8] sm:$0xff]  ;;  %v1136_v23 = vld [vmem:[#allocation2 + $0x38] sm:$0xff]  ;;  %s1315_s7 = sand.u32 1, %s937_s13  }
  0x34   : > { %v788_v20 = vld [vmem:[%s1071_s21] sm:$0xff]  ;;  %v322_v22 = vpack.c.bf16 %v1129_v19, %v1125_v17  ;;  %v1138_v24 = vld [vmem:[#allocation2 + $0x10] sm:$0xff]  ;;  %v1140_v25 = vld [vmem:[#allocation2 + $0x18] sm:$0xff]  ;;  %v355_v26 = vpack.c.bf16 %v1136_v23, %v1132_v21  ;;  %s641_s5 = scalar_lea.hbm %s1307_s3, %s792_s15  ;;  %s630_s8 = scalar_lea.sflag [#allocation4], %s1315_s7 }
  0x35   : > { %286 = vmatpush.bf16.msra.mxu0 %v269_v18  ;;  %v427_v27 = vpack.c.bf16 %v1140_v25, %v1138_v24  ;;  %v1146_v28 = vld [vmem:[#allocation2 + $0x40] sm:$0xff]  ;;  %v1148_v29 = vld [vmem:[#allocation2 + $0x48] sm:$0xff]  ;;  %v1160_v34 = vld [vmem:[#allocation2 + $0x50] sm:$0xff]  ;;  %s644_s6 = sshll.u32 %s641_s5, 4  ;;  %s887_s21 = scalar_lea.hbm %s1307_s3, 96  ;;  %s645_s6 = int_to_ptr.hbm [resolvable:$true] %s644_s6 }
  0x36   : > { %v1150_v30 = vld [vmem:[#allocation2 + $0x20] sm:$0xff]  ;;  %330 = vmatpush.bf16.msra.mxu2 %v322_v22  ;;  %v460_v31 = vpack.c.bf16 %v1148_v29, %v1146_v28  ;;  %v1154_v32 = vld [vmem:[#allocation2 + $0x28] sm:$0xff]  ;;  %v1162_v35 = vld [vmem:[#allocation2 + $0x58] sm:$0xff]  ;;  %s881_s9 = sshra.s32 %s645_s6, 4  ;;  %s882_s9 = int_to_ptr.hbm [resolvable:$true] %s881_s9 }
  0x37   : > { %v530_v33 = vpack.c.bf16 %v1154_v32, %v1150_v30  ;;  %v563_v36 = vpack.c.bf16 %v1162_v35, %v1160_v34  ;;  %v789_v37 = vld [vmem:[%s1076_s29] sm:$0xff]  ;;  %s406_s29 = scalar_select %p222_p0, 1, 0 }
  0x38   : > { %757 = vmatmul.msk.bf16.vlgmr.msra.gmra.mxu0 %vm275_vm1, %v788_v20  ;;  %310 = vmatpush.bf16.msra.mxu1 %v789_v37  ;;  %v411_v12 = vld [vmem:[%s1078_s23] sm:$0xff]  ;;  %s883_s10 = scalar_lea.hbm %s882_s9, 48  ;;  %p888_p6 = scmp.lt.s32.totalorder %s882_s9, %s1307_s3 }
  0x39   : > { %363 = vmatpush.bf16.msrb.mxu0 %v355_v26  ;;  %763 = vmatmul.msk.bf16.vlgmr.msra.gmra.mxu2 %vm275_vm1, %v788_v20  ;;  %v407_v5 = vstv %s406_s29  ;;  %p884_p2 = scmp.ne.s32.totalorder %s882_s9, %s883_s10  ;;  %p889_p7 = scmp.lt.s32.totalorder %s887_s21, %s883_s10 }
  0x3a   : > { %435 = vmatpush.bf16.msrb.mxu2 %v427_v27  ;;  %348 = vmatpush.bf16.msra.mxu3 %v789_v37  ;;  %vm1196_vm2 = vcmp.eq.s32.totalorder %v407_v5, 1 }
  0x3b   : > { %p885_p4 = pnand %p884_p2, %p1035_p3  ;;  %p890_p8 = por %p889_p7, %p888_p6 }
  0x3c   : > { %381 = vmatpush.bf16.msrb.mxu1 %v789_v37 }
  0x3d   : > { %468 = vmatpush.bf16.msra.mxu0 %v460_v31  ;;  %p886_p5 = pneg %p885_p4 }
  0x3e   : > { %538 = vmatpush.bf16.msra.mxu2 %v530_v33  ;;  %453 = vmatpush.bf16.msrb.mxu3 %v789_v37 }
  0x3f   : > { %p891_p10 = pnand %p890_p8, %p886_p5 }
  0x48   : > { %765 = vmatmul.msk.bf16.vlgmr.msrb.gmra.mxu0 %vm275_vm1, %v788_v20 }
  0x49   : > { %767 = vmatmul.msk.bf16.vlgmr.msrb.gmra.mxu2 %vm275_vm1, %v788_v20  ;;  %571 = vmatpush.bf16.msrb.mxu0 %v563_v36  ;;  %v412_v36 = vld [vmem:[%s1078_s23 + $0x8] sm:$0xff] }
  0x58   : > { %769 = vmatmul.msk.bf16.vlgmr.msra.gmra.mxu0 %vm275_vm1, %v788_v20 }
  0x59   : > { %775 = vmatmul.msk.bf16.vlgmr.msra.gmra.mxu2 %vm275_vm1, %v788_v20 }
  0x68   : > { %777 = vmatmul.msk.bf16.vlgmr.msrb.gmra.mxu0 %vm275_vm1, %v788_v20 }
  0xb5   : > { %v288_v38 = vpop.f32.mrf.mxu0 }
  0xbc   : > { %v332_v39 = vpop.f32.mrf.mxu2 }
  0xbd   : > { %v290_v40 = vpop.f32.mrf.mxu0 }
  0xbe   : > { %v293_v41 = vpack.c.bf16 %v290_v40, %v288_v38 }
  0xc0   : > { %762 = vmatmul.msk.bf16.vlgmr.msra.gmra.mxu1 %vm275_vm1, %v293_v41 }
  0xc1   : > { %486 = vmatpush.bf16.msra.mxu1 %v789_v37 }
  0xc4   : > { %v334_v42 = vpop.f32.mrf.mxu2 }
  0xc5   : > { %v337_v43 = vpack.c.bf16 %v334_v42, %v332_v39  ;;  %v365_v44 = vpop.f32.mrf.mxu0 }
  0xc7   : > { %764 = vmatmul.msk.bf16.vlgmr.msra.gmra.mxu3 %vm275_vm1, %v337_v43 }
  0xc8   : > { %556 = vmatpush.bf16.msra.mxu3 %v789_v37 }
  0xcc   : > { %v437_v45 = vpop.f32.mrf.mxu2 }
  0xcd   : > { %v367_v46 = vpop.f32.mrf.mxu0 }
  0xce   : > { %v370_v47 = vpack.c.bf16 %v367_v46, %v365_v44 }
  0xd0   : > { %766 = vmatmul.msk.bf16.vlgmr.msrb.gmra.mxu1 %vm275_vm1, %v370_v47 }
  0xd1   : > { %589 = vmatpush.bf16.msrb.mxu1 %v789_v37 }
  0xd4   : > { %v439_v48 = vpop.f32.mrf.mxu2 }
  0xd5   : > { %v442_v49 = vpack.c.bf16 %v439_v48, %v437_v45  ;;  %v470_v50 = vpop.f32.mrf.mxu0  ;;  %v771_v48 = vld [vmem:[%s1078_s23 + $0x10] sm:$0xff] }
  0xd7   : > { %768 = vmatmul.msk.bf16.vlgmr.msrb.gmra.mxu3 %vm275_vm1, %v442_v49 }
  0xdc   : > { %v540_v51 = vpop.f32.mrf.mxu2 }
  0xdd   : > { %v472_v52 = vpop.f32.mrf.mxu0 }
  0xde   : > { %v475_v53 = vpack.c.bf16 %v472_v52, %v470_v50 }
  0xe0   : > { %770 = vmatmul.msk.bf16.vlgmr.msra.gmra.mxu1 %vm275_vm1, %v475_v53 }
  0xe4   : > { %v542_v54 = vpop.f32.mrf.mxu2 }
  0xe5   : > { %v545_v55 = vpack.c.bf16 %v542_v54, %v540_v51  ;;  %v573_v56 = vpop.f32.mrf.mxu0 }
  0xe7   : > { %776 = vmatmul.msk.bf16.vlgmr.msra.gmra.mxu3 %vm275_vm1, %v545_v55 }
  0xed   : > { %v575_v57 = vpop.f32.mrf.mxu0 }
  0xee   : > { %v578_v58 = vpack.c.bf16 %v575_v57, %v573_v56 }
  0xf0   : > { %778 = vmatmul.msk.bf16.vlgmr.msrb.gmra.mxu1 %vm275_vm1, %v578_v58 }
 0x13d   : > { %v1179_v59 = vpop.f32.mrf.mxu1 }
 0x13e   : > { %627 = vst.msk [vmem:[#allocation2 + $0x60] sm:$0xff] %vm275_vm1, %v1179_v59 }
 0x145   : > { %v1183_v60 = vpop.f32.mrf.mxu1 }
 0x146   : > { %628 = vst.msk [vmem:[#allocation2 + $0x68] sm:$0xff] %vm275_vm1, %v1183_v60 }
 0x14a   : > { %v350_v61 = vpop.f32.mrf.mxu3 }
 0x14b   : > { %417 = vst.msk [vmem:[#allocation2] sm:$0xff] %vm275_vm1, %v350_v61  ;;  %v388_v63 = vsub.f32 %v1125_v17, %v350_v61 }
 0x14d   : > { %v383_v62 = vpop.f32.mrf.mxu1 }
 0x14e   : > { %v390_v0 = vsub.f32 %v1132_v21, %v383_v62  ;;  %v398_v1 = vsub.f32 %v383_v62, %v350_v61  ;;  %419 = vst.msk [vmem:[#allocation2 + $0x30] sm:$0xff] %vm275_vm1, %v383_v62  ;;  %v772_v62 = vld [vmem:[%s1078_s23 + $0x18] sm:$0xff] }
 0x150   : > { %v392_v2 = vsub.f32 %v390_v0, %v388_v63  ;;  %v400_v3 = vmul.f32 %v398_v1, %v1179_v59 }
 0x152   : > { %v394_v4 = vmul.f32 %v392_v2, %v1121_v15  ;;  %v352_v6 = vpop.f32.mrf.mxu3  ;;  %v402_v8 = vadd.f32 %v400_v3, %v350_v61 }
 0x153   : > { %418 = vst.msk [vmem:[#allocation2 + $0x8] sm:$0xff] %vm275_vm1, %v352_v6  ;;  %v389_v13 = vsub.f32 %v1129_v19, %v352_v6 }
 0x154   : > { %v396_v7 = vadd.f32 %v394_v4, %v388_v63 }
 0x155   : > { %v385_v10 = vpop.f32.mrf.mxu1 }
 0x156   : > { %v404_v11 = vadd.f32 %v402_v8, %v396_v7  ;;  %v391_v14 = vsub.f32 %v1136_v23, %v385_v10  ;;  %v399_v17 = vsub.f32 %v385_v10, %v352_v6  ;;  %420 = vst.msk [vmem:[#allocation2 + $0x38] sm:$0xff] %vm275_vm1, %v385_v10 }
 0x158   : > { %v409_v18 = vsel %vm1196_vm2, %v404_v11, %v396_v7  ;;  %v393_v20 = vsub.f32 %v391_v14, %v389_v13  ;;  %v401_v21 = vmul.f32 %v399_v17, %v1183_v60  ;;  %v779_v11 = vld [vmem:[%s1078_s23 + $0x20] sm:$0xff] }
 0x159   : > { %v413_v22 = vadd.f32 %v411_v12, %v409_v18 }
 0x15a   : > { %v395_v26 = vmul.f32 %v393_v20, %v1123_v16  ;;  %v455_v27 = vpop.f32.mrf.mxu3  ;;  %v403_v19 = vadd.f32 %v401_v21, %v352_v6 }
 0x15b   : > { %415 = vst.msk [vmem:[%s1078_s23] sm:$0xff] %vm275_vm1, %v413_v22  ;;  %v493_v37 = vsub.f32 %v1138_v24, %v455_v27  ;;  %v780_v22 = vld [vmem:[%s1078_s23 + $0x28] sm:$0xff] }
 0x15c   : > { %v397_v31 = vadd.f32 %v395_v26, %v389_v13  ;;  %520 = vst.msk [vmem:[#allocation2 + $0x10] sm:$0xff] %vm275_vm1, %v455_v27 }
 0x15d   : > { %v488_v23 = vpop.f32.mrf.mxu1 }
 0x15e   : > { %v405_v33 = vadd.f32 %v403_v19, %v397_v31  ;;  %v495_v38 = vsub.f32 %v1146_v28, %v488_v23  ;;  %v503_v39 = vsub.f32 %v488_v23, %v455_v27  ;;  %522 = vst.msk [vmem:[#allocation2 + $0x40] sm:$0xff] %vm275_vm1, %v488_v23 }
 0x160   : > { %v410_v40 = vsel %vm1196_vm2, %v405_v33, %v397_v31  ;;  %v497_v41 = vsub.f32 %v495_v38, %v493_v37  ;;  %v505_v42 = vmul.f32 %v503_v39, %v1179_v59 }
 0x161   : > { %v414_v43 = vadd.f32 %v412_v36, %v410_v40 }
 0x162   : > { %v499_v44 = vmul.f32 %v497_v41, %v1121_v15  ;;  %v457_v45 = vpop.f32.mrf.mxu3  ;;  %v507_v24 = vadd.f32 %v505_v42, %v455_v27 }
 0x163   : > { %416 = vst.msk [vmem:[%s1078_s23 + $0x8] sm:$0xff] %vm275_vm1, %v414_v43  ;;  %v494_v49 = vsub.f32 %v1140_v25, %v457_v45 }
 0x164   : > { %v501_v46 = vadd.f32 %v499_v44, %v493_v37  ;;  %521 = vst.msk [vmem:[#allocation2 + $0x18] sm:$0xff] %vm275_vm1, %v457_v45 }
 0x165   : > { %v490_v28 = vpop.f32.mrf.mxu1 }
 0x166   : > { %v509_v47 = vadd.f32 %v507_v24, %v501_v46  ;;  %v496_v50 = vsub.f32 %v1148_v29, %v490_v28  ;;  %v504_v51 = vsub.f32 %v490_v28, %v457_v45  ;;  %523 = vst.msk [vmem:[#allocation2 + $0x48] sm:$0xff] %vm275_vm1, %v490_v28 }
 0x168   : > { %v511_v52 = vsel %vm1196_vm2, %v509_v47, %v501_v46  ;;  %v498_v53 = vsub.f32 %v496_v50, %v494_v49  ;;  %v506_v54 = vmul.f32 %v504_v51, %v1183_v60 }
 0x169   : > { %v516_v55 = vadd.f32 %v771_v48, %v511_v52 }
 0x16a   : > { %v500_v56 = vmul.f32 %v498_v53, %v1123_v16  ;;  %v558_v57 = vpop.f32.mrf.mxu3  ;;  %v508_v25 = vadd.f32 %v506_v54, %v457_v45 }
 0x16b   : > { %773 = vst.msk [vmem:[%s1078_s23 + $0x10] sm:$0xff] %vm275_vm1, %v516_v55  ;;  %v596_v63 = vsub.f32 %v1150_v30, %v558_v57 }
 0x16c   : > { %v502_v58 = vadd.f32 %v500_v56, %v494_v49  ;;  %623 = vst.msk [vmem:[#allocation2 + $0x20] sm:$0xff] %vm275_vm1, %v558_v57 }
 0x16d   : > { %v591_v29 = vpop.f32.mrf.mxu1 }
 0x16e   : > { %v510_v61 = vadd.f32 %v508_v25, %v502_v58  ;;  %v598_v0 = vsub.f32 %v1160_v34, %v591_v29  ;;  %v606_v1 = vsub.f32 %v591_v29, %v558_v57  ;;  %625 = vst.msk [vmem:[#allocation2 + $0x50] sm:$0xff] %vm275_vm1, %v591_v29 }
 0x170   : > { %v512_v2 = vsel %vm1196_vm2, %v510_v61, %v502_v58  ;;  %v600_v3 = vsub.f32 %v598_v0, %v596_v63  ;;  %v608_v4 = vmul.f32 %v606_v1, %v1179_v59 }
 0x171   : > { %v517_v5 = vadd.f32 %v772_v62, %v512_v2 }
 0x172   : > { %v602_v6 = vmul.f32 %v600_v3, %v1121_v15  ;;  %v560_v7 = vpop.f32.mrf.mxu3  ;;  %v610_v8 = vadd.f32 %v608_v4, %v558_v57 }
 0x173   : > { %774 = vst.msk [vmem:[%s1078_s23 + $0x18] sm:$0xff] %vm275_vm1, %v517_v5  ;;  %v597_v12 = vsub.f32 %v1154_v32, %v560_v7 }
 0x174   : > { %v604_v30 = vadd.f32 %v602_v6, %v596_v63  ;;  %624 = vst.msk [vmem:[#allocation2 + $0x28] sm:$0xff] %vm275_vm1, %v560_v7 }
 0x175   : > { %v593_v34 = vpop.f32.mrf.mxu1 }
 0x176   : > { %v612_v10 = vadd.f32 %v610_v8, %v604_v30  ;;  %v599_v13 = vsub.f32 %v1162_v35, %v593_v34  ;;  %v607_v59 = vsub.f32 %v593_v34, %v560_v7  ;;  %626 = vst.msk [vmem:[#allocation2 + $0x58] sm:$0xff] %vm275_vm1, %v593_v34 }
 0x178   : > { %v614_v15 = vsel %vm1196_vm2, %v612_v10, %v604_v30  ;;  %v601_v14 = vsub.f32 %v599_v13, %v597_v12  ;;  %v609_v17 = vmul.f32 %v607_v59, %v1183_v60 }
 0x179   : > { %v619_v18 = vadd.f32 %v779_v11, %v614_v15 }
 0x17a   : > { %v603_v20 = vmul.f32 %v601_v14, %v1123_v16  ;;  %v611_v35 = vadd.f32 %v609_v17, %v560_v7 }
 0x17b   : > { %781 = vst.msk [vmem:[%s1078_s23 + $0x20] sm:$0xff] %vm275_vm1, %v619_v18 }
 0x17c   : > { %v605_v32 = vadd.f32 %v603_v20, %v597_v12 }
 0x17e   : > { %v613_v21 = vadd.f32 %v611_v35, %v605_v32 }
 0x180   : > { %v615_v60 = vsel %vm1196_vm2, %v613_v21, %v605_v32 }
 0x181   : > { %v620_v26 = vadd.f32 %v780_v22, %v615_v60 }
 0x183   : > { %782 = vst.msk [vmem:[%s1078_s23 + $0x28] sm:$0xff] %vm275_vm1, %v620_v26 }
 0x184   : > { %894 = shalt.err (!%p891_p10)
}
 0x185   : > { %s964_s23 = smov 128   ;;  %s965_s29 = smov 8  }
 0x186   : > { %793 = dma.vmem_to_hbm [thread:$0]  (%p1035_p3), %s643_s16, 768, %s645_s6, %s630_s8, %s964_s23, %s964_s23, %s965_s29  }
 0x187 PF: > { %p799_p11 = scmp.ge.s32.totalorder %s961_s19, 2  ;;  %s659_s15 = sand.u32 1, %s933_s12  }
 0x188   : > { %s660_s30 = scalar_lea.sflag [#allocation4], %s659_s15 }
 0x189   : > { %p796_p12 = pnand %p799_p11, %p1045_p9 }
 0x18b   : > { %p797_p13 = pneg %p796_p12 }
 0x18d   : > { %928 = dma.done.wait (%p797_p13), %s660_s30, 768  }
 0x18e   : > { %930 = vsyncadd (%p797_p13), %s660_s30, 4294966528  ;;  %s16_s19 = sadd.s32 1, %s961_s19   ;;  %s1316_s24 = sld [smem:[#allocation6_spill]] }
 0x18f   : > { %p13_p0 = scmp.ge.s32.totalorder %s16_s19, 6   ;;  %s1317_s12 = smov %s937_s13 }
 0x190   : > { %s1318_s13 = smov %s941_s14  ;;  %s1319_s14 = smov %s1053_s28 }
 0x191   : > { %s1320_s15 = smov %s953_s17  ;;  %s1321_s16 = smov %s957_s18 }
 0x192   : > { %s1322_s17 = smov %s1325_s22  ;;  %15 = sbr.rel (!%p13_p0) target bundleno = 5 (0x5), region = 85 }
 0x194   : > { %s1323_s18 = smov %s1316_s24 }
 0x197   :  { %666 = vsyncpa [#allocation4], 1 }
 0x198   :  { %668 = vsyncpa [#allocation4 + $0x1], 1 }

</bundles_post_ra>
